<compile_context>
chip_gen: v7x
topology: tpu7x:2x2x1
jax: 0.10.0
libtpu: 0.0.40
codegen_flags: <defaults>
</compile_context>

<pallas_src>
import math
import random

import jax
import jax.numpy as jnp
import numpy as np
from jax.experimental import pallas as pl
from jax.experimental.pallas import tpu as pltpu


def _rand_overturn_kernel(x_ref, o_ref):
    # x_ref / o_ref: (tm, F) tile of rows; F is the lane axis.
    x = x_ref[...].astype(jnp.float32)
    mean = jnp.mean(x, axis=-1, keepdims=True)          # XLU lane reduce
    # torch does: (x - mean) * -1 + mean  ==  (mean - x) + mean
    o_ref[...] = ((mean - x) + mean).astype(o_ref.dtype)


def _pick_row_tile(T: int) -> int:
    """Largest power-of-two row tile (multiple of 8 sublanes) dividing T."""
    if T % 8 != 0:
        return T  # full-extent block (allowed when equal to array dim)
    for tm in (512, 256, 128, 64, 32, 16, 8):
        if tm <= T and T % tm == 0:
            return tm
    return T


def _rand_overturn_pallas(x2d: jax.Array) -> jax.Array:
    """x2d: (T, F). Returns (T, F) with each row reflected around its mean."""
    T, F = x2d.shape
    tm = _pick_row_tile(T)
    grid = (T // tm,) if T % tm == 0 else (1,)

    return pl.pallas_call(
        _rand_overturn_kernel,
        out_shape=jax.ShapeDtypeStruct((T, F), x2d.dtype),
        grid=grid,
        in_specs=[pl.BlockSpec((tm, F), lambda i: (i, 0))],
        out_specs=pl.BlockSpec((tm, F), lambda i: (i, 0)),
        compiler_params=pltpu.CompilerParams(
            dimension_semantics=("parallel",)
        ),
    )(x2d)


# One compiled executable per (T, F, dtype); avoids per-call retracing.
_rand_overturn_jit = jax.jit(_rand_overturn_pallas)


class RandOverturn:
    """JAX/Pallas port of the PyTorch RandOverturn module."""

    def __init__(self, p: float):
        self.p = p

    def __call__(self, csi: jax.Array) -> jax.Array:
        # Host-side probability branch, mirroring the PyTorch module.
        # TODO(synk): for fully-jittable pipelines, draw the branch with
        # jax.random + lax.cond instead of Python's random module.
        if random.random() > self.p:
            return csi
        T, F = csi.shape[-2], csi.shape[-1]
        x2d = jnp.reshape(csi, (T, F))
        out2d = _rand_overturn_jit(x2d)
        return jnp.reshape(out2d, (1, T, F))

    def __repr__(self) -> str:
        return f"{self.__class__.__name__}()"


def _reference_numpy(csi: np.ndarray) -> np.ndarray:
    """Mirror of the torch forward (the 'apply' branch) in numpy."""
    x = np.array(np.squeeze(csi), dtype=np.float32, copy=True)
    T, F = x.shape
    for i in range(T):
        m = x[i, :].mean()
        x[i, :] = (x[i, :] - m) * -1
        x[i, :] = x[i, :] + m
    return x.reshape(1, T, F)


if __name__ == "__main__":
    # Deterministic Python-level randomness (branch choice).
    random.seed(0)

    # Small shape consistent with csi.squeeze() -> (T, F): T=16, F=128.
    key = jax.random.PRNGKey(0)
    csi = jax.random.normal(key, (1, 16, 128), dtype=jnp.float32)

    # p=1.0 so the overturn branch (the kernel path) is always exercised.
    module = RandOverturn(p=1.0)

    out = module(csi)
    out = jax.block_until_ready(out)

    ref = _reference_numpy(np.asarray(csi))
    np.testing.assert_allclose(np.asarray(out), ref, rtol=1e-5, atol=1e-6)
    assert out.shape == (1, 16, 128)

    print("KERNEL_OK")
</pallas_src>

<mosaic_0001>
module attributes {stable_mosaic.version = 11 : i64} {
  func.func @_rand_overturn_kernel(%arg0: i32, %arg1: memref<16x128xf32, #tpu.memory_space<vmem>>, %arg2: memref<16x128xf32, #tpu.memory_space<vmem>>) attributes {dimension_semantics = [#tpu.dimension_semantics<parallel>], iteration_bounds = array<i64: 1>, scalar_prefetch = 0 : i64, scratch_operands = 0 : i64, tpu.core_type = #tpu.core_type<tc>, window_params = [{transform_indices = @transform_0, window_bounds = array<i64: 16, 128>}, {transform_indices = @transform_1, window_bounds = array<i64: 16, 128>}]} {
    %c0 = arith.constant 0 : index
    %c0_0 = arith.constant 0 : index
    %0 = vector.load %arg1[%c0, %c0_0] : memref<16x128xf32, #tpu.memory_space<vmem>>, vector<16x128xf32>
    %cst = arith.constant dense<0.000000e+00> : vector<16xf32>
    %1 = vector.multi_reduction <add>, %0, %cst [1] : vector<16x128xf32> to vector<16xf32>
    %2 = vector.shape_cast %1 : vector<16xf32> to vector<16x1xf32>
    %cst_1 = arith.constant 1.280000e+02 : f32
    %3 = vector.broadcast %cst_1 : f32 to vector<16x1xf32>
    %4 = arith.divf %2, %3 : vector<16x1xf32>
    %5 = vector.broadcast %4 : vector<16x1xf32> to vector<16x128xf32>
    %6 = arith.subf %5, %0 : vector<16x128xf32>
    %7 = vector.broadcast %4 : vector<16x1xf32> to vector<16x128xf32>
    %8 = arith.addf %6, %7 : vector<16x128xf32>
    %c0_2 = arith.constant 0 : index
    %c0_3 = arith.constant 0 : index
    %9 = vector.load %arg2[%c0_2, %c0_3] : memref<16x128xf32, #tpu.memory_space<vmem>>, vector<16x128xf32>
    tpu.vector_store %arg2[%c0_2, %c0_3], %8 {strides = array<i32>} : memref<16x128xf32, #tpu.memory_space<vmem>>, vector<16x128xf32>,
    return
  }
  func.func @transform_0(%arg0: i32) -> (i32, i32) {
    %c0_i32 = arith.constant 0 : i32
    %c0_i32_0 = arith.constant 0 : i32
    return %arg0, %c0_i32 : i32, i32
  }
  func.func @transform_1(%arg0: i32) -> (i32, i32) {
    %c0_i32 = arith.constant 0 : i32
    %c0_i32_0 = arith.constant 0 : i32
    return %arg0, %c0_i32 : i32, i32
  }
}

</mosaic_0001>

<bundles_post_ra>
// kernel: _rand_overturn_pallas.1
= control target key start
LH: loop header
LB: loop body
LE: loop exit
PB: predicated region body
PF: predicated region fallthrough
CT: control target
= control target key end

     0   :  { %6 = vsyncpa [#allocation3], 0  ;;  %s151_s0 = inlined_call_operand.hbm [shape: f32[16,128], index: 0, kind: input, shape index: {}]   ;;  %s152_s1 = inlined_call_operand.hbm [shape: f32[16,128], index: 1, kind: output, shape index: {}]  }
   0x1   :  { %7 = vsyncpa [#allocation4], 0  ;;  %s107_s6 = smov [#allocation2]   ;;  %s59_s10 = scalar_lea.hbm %s151_s0, 256 }
   0x2   :  { %s13_s7 = sshll.u32 %s107_s6, 4  ;;  %p60_p0 = scmp.ne.s32.totalorder %s151_s0, %s59_s10  ;;  %s14_s7 = int_to_ptr.vmem [resolvable:$true] %s13_s7 }
   0x3   :  { %p63_p1 = scmp.lt.u32.totalorder %s59_s10, %s151_s0 }
   0x5   :  { %p65_p2 = pnand %p63_p1, %p60_p0 }
   0x7   :  { %68 = shalt.err (!%p65_p2)
}
   0x8   :  { %s69_s15 = scalar_lea.vmem %s14_s7, 256  ;;  %p74_p4 = scmp.lt.s32.totalorder %s14_s7, %s14_s7 }
   0x9   :  { %p70_p3 = scmp.ne.s32.totalorder %s14_s7, %s69_s15  ;;  %p75_p5 = scmp.lt.s32.totalorder %s69_s15, %s69_s15 }
   0xb   :  { %p76_p6 = por %p75_p5, %p74_p4 }
   0xd   :  { %p77_p7 = pnand %p76_p6, %p70_p3 }
   0xf   :  { %80 = shalt.err (!%p77_p7)
}
  0x10   :  { %s108_s16 = smov 128   ;;  %s109_s17 = smov 8  }
  0x11   :  { %19 = dma.hbm_to_vmem [thread:$0]  %s151_s0, 256, %s14_s7, [#allocation3], %s108_s16, %s108_s16, %s109_s17  }
  0x12   :  { %103 = dma.done.wait [#allocation3], 256  }
  0x13   :  { %104 = vsyncadd [#allocation3], 4294967040  ;;  %v23_v0 = vld [vmem:[#allocation2] sm:$0xff]  ;;  %v24_v1 = vld [vmem:[#allocation2 + $0x8] sm:$0xff]  ;;  %s110_s20 = smov [#allocation5]  }
  0x14   :  { %25 = vadd.xlane.f32.xlu0 %v23_v0  ;;  %s43_s21 = sshll.u32 %s110_s20, 4  ;;  %s44_s21 = int_to_ptr.vmem [resolvable:$true] %s43_s21 }
  0x15   :  { %s81_s0 = scalar_lea.vmem %s44_s21, 256  ;;  %p86_p9 = scmp.lt.s32.totalorder %s44_s21, %s44_s21 }
  0x16   :  { %p82_p8 = scmp.ne.s32.totalorder %s44_s21, %s81_s0  ;;  %p87_p10 = scmp.lt.s32.totalorder %s81_s0, %s81_s0 }
  0x18   :  { %27 = vadd.xlane.f32.xlu0 %v24_v1  ;;  %p88_p11 = por %p87_p10, %p86_p9 }
  0x1a   :  { %p89_p12 = pnand %p88_p11, %p82_p8 }
  0xa1   :  { %v26_v2 = vpop.xlane.xlu0 %25 }
  0xa2   :  { %v30_v3 = vmul.f32 0.0078125, %v26_v2 }
  0xa4   :  { %v32_v4 = vsub.f32 %v30_v3, %v23_v0 }
  0xa5   :  { %v28_v5 = vpop.xlane.xlu0 %27 }
  0xa6   :  { %v34_v6 = vadd.f32 %v32_v4, %v30_v3  ;;  %v31_v7 = vmul.f32 0.0078125, %v28_v5 }
  0xa8   :  { %36 = vst [vmem:[#allocation5] sm:$0xff] %v34_v6  ;;  %v33_v8 = vsub.f32 %v31_v7, %v24_v1 }
  0xaa   :  { %v35_v9 = vadd.f32 %v33_v8, %v31_v7 }
  0xac   :  { %37 = vst [vmem:[#allocation5 + $0x8] sm:$0xff] %v35_v9 }
  0xad   :  { %92 = shalt.err (!%p89_p12)
}
  0xae   :  { %s93_s24 = scalar_lea.hbm %s152_s1, 256 }
  0xaf   :  { %p94_p13 = scmp.ne.s32.totalorder %s152_s1, %s93_s24  ;;  %p97_p0 = scmp.lt.u32.totalorder %s93_s24, %s152_s1 }
  0xb1   :  { %p99_p1 = pnand %p97_p0, %p94_p13 }
  0xb3   :  { %102 = shalt.err (!%p99_p1)
}
  0xb4   :  { %49 = dma.vmem_to_hbm [thread:$0]  %s44_s21, 256, %s152_s1, [#allocation4], %s108_s16, %s108_s16, %s109_s17  }
  0xb5   :  { %105 = dma.done.wait [#allocation4], 256  }
  0xb6   :  { %106 = vsyncadd [#allocation4], 4294967040 }
  0xb7   :  { %53 = vsyncpa [#allocation3], 1 }
  0xb8   :  { %54 = vsyncpa [#allocation4], 1 }

</bundles_post_ra>
